<compile_context>
chip_gen: v5e
topology: v5e:2x2
jax: 0.10.0
libtpu: 0.0.40
codegen_flags: <defaults>
</compile_context>

<pallas_src>
import functools

import jax
import jax.numpy as jnp
from jax import lax
from jax.experimental import pallas as pl
from jax.experimental.pallas import tpu as pltpu


def _round_up(x, m):
    return (x + m - 1) // m * m


def _sublane_multiple(dt):
    # Minimum sublane multiple for a packed dtype: f32 -> 8, bf16 -> 16, int8/fp8 -> 32.
    return {4: 8, 2: 16, 1: 32}.get(jnp.dtype(dt).itemsize, 8)


def _pad2d(a, rows, cols):
    """Zero-pad a 2-D array to (rows, cols); no copy when already aligned."""
    if a.shape == (rows, cols):
        return a
    return jnp.zeros((rows, cols), a.dtype).at[: a.shape[0], : a.shape[1]].set(a)


def _vmem_capacity_bytes():
    try:
        cap = int(getattr(pltpu.get_tpu_info(), "vmem_capacity_bytes"))
        if cap > 0:
            return cap
    except Exception:
        pass
    return 64 * 1024 * 1024          # conservative (v7x per-core) fallback


def _vmem_limit_bytes(resident_bytes, cap):
    want = int(resident_bytes * 1.5) + (4 << 20)
    return int(max(32 << 20, min(want, cap - (8 << 20))))


# ----------------------------------------------------------------------------------- #
# Kernel 1: fused Q|K|V projection (runs once over the sequence).
# ----------------------------------------------------------------------------------- #
def _qkv_proj_kernel(x_ref, w_ref, q_ref, k_ref, v_ref, *, d_out_p, sum_lane, mxu_dtype):
    # Contract last dims of both operands (x @ W.T with PyTorch (d_out, d_in) weights)
    # so the MXU handles the "transpose" and no XLU transpose is emitted.
    dn_last_last = (((1,), (1,)), ((), ()))
    y = lax.dot_general(x_ref[...].astype(mxu_dtype), w_ref[...], dn_last_last,
                        preferred_element_type=jnp.float32)        # (ts, 3*d_out_p)
    q_ref[...] = y[:, :d_out_p].astype(q_ref.dtype)                # already scaled
    k_ref[...] = y[:, d_out_p:2 * d_out_p].astype(k_ref.dtype)
    v = y[:, 2 * d_out_p:]
    if sum_lane is not None:
        # Spare zero-padded V lane carries a column of ones so the softmax row-sum is
        # produced for free by the P@V matmul in the attention kernel.
        lane = lax.broadcasted_iota(jnp.int32, v.shape, 1)
        v = jnp.where(lane == sum_lane, 1.0, v)
    v_ref[...] = v.astype(v_ref.dtype)


# ----------------------------------------------------------------------------------- #
# Kernel 2: flash attention over precomputed Q/K/V tiles.
# ----------------------------------------------------------------------------------- #
def _flash_attn_kernel(q_ref, k_ref, v_ref, o_ref, m_sc, l_sc, acc_sc, *,
                       kv_tile, s_actual, need_kv_mask, sum_lane, mxu_dtype, exact_recip):
    ki = pl.program_id(1)
    nk = pl.num_programs(1)
    dn_last_last = (((1,), (1,)), ((), ()))
    fold_sum = sum_lane is not None

    @pl.when(ki == 0)
    def _init():
        m_sc[...] = jnp.full_like(m_sc, -jnp.inf)
        acc_sc[...] = jnp.zeros_like(acc_sc)
        if not fold_sum:
            l_sc[...] = jnp.zeros_like(l_sc)

    # Scores for this (query tile, KV tile) pair: q @ k.T via last-dim contraction.
    s = lax.dot_general(q_ref[...], k_ref[...], dn_last_last,
                        preferred_element_type=jnp.float32)        # (tq, tkv)

    if need_kv_mask:
        # Cheap padding mask: (1, tkv) additive bias + one broadcast add, instead of
        # iota/compare/select over the full (tq, tkv) tile every step.
        col = ki * kv_tile + lax.broadcasted_iota(jnp.int32, (1, kv_tile), 1)
        s = s + jnp.where(col < s_actual, 0.0, -jnp.inf).astype(jnp.float32)

    # Online (flash) softmax update.
    m_prev = m_sc[...]
    m_new = jnp.maximum(m_prev, jnp.max(s, axis=-1, keepdims=True))
    alpha = jnp.exp(m_prev - m_new)
    p = jnp.exp(s - m_new)
    if not fold_sum:
        l_sc[...] = alpha * l_sc[...] + jnp.sum(p, axis=-1, keepdims=True)
    acc_sc[...] = alpha * acc_sc[...] + jnp.dot(
        p.astype(mxu_dtype), v_ref[...], preferred_element_type=jnp.float32)
    m_sc[...] = m_new

    @pl.when(ki == nk - 1)
    def _finalize():
        acc = acc_sc[...]
        l = acc[:, sum_lane:sum_lane + 1] if fold_sum else l_sc[...]
        inv_l = pl.reciprocal(l, approx=not exact_recip)
        o_ref[...] = (acc * inv_l).astype(o_ref.dtype)


# ----------------------------------------------------------------------------------- #
# Wrapper.
# ----------------------------------------------------------------------------------- #
def self_attention_v2(x, w_query, w_key, w_value, *, tile_q=512, tile_kv=256,
                      mxu_dtype=None):
    """SelfAttention_v2 forward.

    x:   (S, d_in) activations.
    w_*: PyTorch nn.Linear(d_in, d_out, bias=False).weight, shape (d_out, d_in),
         consumed in that layout (no wrapper-side transpose).
    mxu_dtype: dtype of MXU operands. Defaults to bfloat16 for f32 inputs (rated MXU
         throughput on v6e/v7x); accumulation is always float32. Pass jnp.float32 for
         exact matmuls (tight tolerances, or v5e cast-traffic concerns).
    """
    S, d_in = x.shape
    d_out = w_query.shape[0]
    dtype = x.dtype
    if mxu_dtype is None:
        mxu_dtype = jnp.bfloat16 if dtype == jnp.float32 else dtype
    mxu_dtype = jnp.dtype(mxu_dtype)

    sub = max(_sublane_multiple(dtype), _sublane_multiple(mxu_dtype))
    d_in_p = _round_up(d_in, 128)
    d_out_p = _round_up(d_out, 128)

    mxu_b = mxu_dtype.itemsize
    x_b = jnp.dtype(dtype).itemsize
    out_b = x_b

    # --- tile selection -------------------------------------------------------------
    s_ru = _round_up(S, sub)
    tq = max(sub, min(_round_up(tile_q, sub), s_ru))
    # Keep >= 2 query tiles when S is big enough so the "parallel" qi axis can shard
    # across both TensorCores on dual-TC chips (v7x).
    if tq >= s_ru and S >= 256:
        tq = _round_up((S + 1) // 2, sub)
    tkv = max(sub, min(_round_up(tile_kv, sub), s_ru))

    # Generation-aware VMEM budget: shrink tiles until the attention-call footprint
    # fits comfortably (v7x has 64 MiB VMEM vs 128 MiB on v5e/v6e).
    cap = _vmem_capacity_bytes()

    def attn_resident(tq_, tkv_):
        return (2 * tq_ * d_out_p * mxu_b            # Q block (double-buffered)
                + 2 * 2 * tkv_ * d_out_p * mxu_b     # K and V blocks
                + 2 * tq_ * d_out_p * out_b          # output block
                + tq_ * d_out_p * 4 + 2 * tq_ * 4)   # f32 accumulator + m/l scratch

    budget = int(cap * 0.6)
    while attn_resident(tq, tkv) > budget and max(tq, tkv) > sub:
        if tq >= tkv and tq > sub:
            tq = max(sub, _round_up(tq // 2, sub))
        else:
            tkv = max(sub, _round_up(tkv // 2, sub))

    # Keep one tile size a multiple of the other so one padded length serves both
    # tilings without excessive padding.
    if tq % tkv != 0 and tkv % tq != 0:
        tkv = tq
    s_p = _round_up(S, max(tq, tkv))
    n_q = s_p // tq
    n_k = s_p // tkv
    ts = tq                      # projection-pass sequence tile (tq divides s_p)

    need_kv_mask = s_p != S
    fold_sum = d_out < d_out_p   # spare padded V lane available for the row-sum
    sum_lane = d_out if fold_sum else None

    # --- operand prep (weights constant per model: hoist to init in real deployments)
    scale = 1.0 / float(d_out) ** 0.5
    w_all = jnp.concatenate([
        _pad2d((w_query * scale).astype(mxu_dtype), d_out_p, d_in_p),   # pre-scaled Q
        _pad2d(w_key.astype(mxu_dtype), d_out_p, d_in_p),
        _pad2d(w_value.astype(mxu_dtype), d_out_p, d_in_p),
    ], axis=0)                                          # (3*d_out_p, d_in_p), bf16 by default
    x_p = _pad2d(x, s_p, d_in_p)

    # --- pass 1: fused Q|K|V projection ----------------------------------------------
    proj_resident = (2 * ts * d_in_p * x_b
                     + 2 * 3 * d_out_p * d_in_p * mxu_b
                     + 2 * 3 * ts * d_out_p * mxu_b)
    proj_cost = pl.CostEstimate(
        flops=2 * s_p * d_in_p * 3 * d_out_p,
        transcendentals=0,
        bytes_accessed=(s_p * d_in_p * x_b + 3 * d_out_p * d_in_p * mxu_b
                        + 3 * s_p * d_out_p * mxu_b))

    qkv_shape = jax.ShapeDtypeStruct((s_p, d_out_p), mxu_dtype)
    q_buf, k_buf, v_buf = pl.pallas_call(
        functools.partial(_qkv_proj_kernel, d_out_p=d_out_p, sum_lane=sum_lane,
                          mxu_dtype=mxu_dtype),
        out_shape=(qkv_shape, qkv_shape, qkv_shape),
        grid_spec=pltpu.PrefetchScalarGridSpec(
            num_scalar_prefetch=0,
            grid=(s_p // ts,),
            in_specs=[
                pl.BlockSpec((ts, d_in_p), lambda i: (i, 0)),
                pl.BlockSpec((3 * d_out_p, d_in_p), lambda i: (0, 0)),   # resident weights
            ],
            out_specs=(
                pl.BlockSpec((ts, d_out_p), lambda i: (i, 0)),
                pl.BlockSpec((ts, d_out_p), lambda i: (i, 0)),
                pl.BlockSpec((ts, d_out_p), lambda i: (i, 0)),
            ),
        ),
        compiler_params=pltpu.CompilerParams(
            dimension_semantics=("parallel",),
            vmem_limit_bytes=_vmem_limit_bytes(proj_resident, cap)),
        cost_estimate=proj_cost,
    )(x_p, w_all)

    # --- pass 2: flash attention -------------------------------------------------------
    attn_cost = pl.CostEstimate(
        flops=4 * s_p * s_p * d_out_p,
        transcendentals=s_p * s_p + 2 * s_p * n_k,
        bytes_accessed=(s_p * d_out_p * mxu_b               # Q read once
                        + n_q * 2 * s_p * d_out_p * mxu_b   # K,V re-read per query tile
                        + s_p * d_out_p * out_b))           # output write

    out_p = pl.pallas_call(
        functools.partial(_flash_attn_kernel, kv_tile=tkv, s_actual=S,
                          need_kv_mask=need_kv_mask, sum_lane=sum_lane,
                          mxu_dtype=mxu_dtype,
                          exact_recip=(jnp.dtype(dtype) == jnp.float32)),
        out_shape=jax.ShapeDtypeStruct((s_p, d_out_p), dtype),
        grid_spec=pltpu.PrefetchScalarGridSpec(
            num_scalar_prefetch=0,
            grid=(n_q, n_k),
            in_specs=[
                pl.BlockSpec((tq, d_out_p), lambda qi, ki: (qi, 0)),
                pl.BlockSpec((tkv, d_out_p), lambda qi, ki: (ki, 0)),
                pl.BlockSpec((tkv, d_out_p), lambda qi, ki: (ki, 0)),
            ],
            out_specs=pl.BlockSpec((tq, d_out_p), lambda qi, ki: (qi, 0)),
            scratch_shapes=[
                pltpu.VMEM((tq, 1), jnp.float32),         # running max
                pltpu.VMEM((tq, 1), jnp.float32),         # running sum (unused if folded)
                pltpu.VMEM((tq, d_out_p), jnp.float32),   # output accumulator
            ],
        ),
        compiler_params=pltpu.CompilerParams(
            dimension_semantics=("parallel", "arbitrary"),
            vmem_limit_bytes=_vmem_limit_bytes(attn_resident(tq, tkv), cap)),
        cost_estimate=attn_cost,
    )(q_buf, k_buf, v_buf)

    return out_p[:S, :d_out]


def _reference(x, w_query, w_key, w_value):
    q = x @ w_query.T
    k = x @ w_key.T
    v = x @ w_value.T
    scores = q @ k.T / jnp.sqrt(jnp.float32(k.shape[-1]))
    w = jax.nn.softmax(scores, axis=-1)
    return w @ v


if __name__ == "__main__":
    # Primary small test (matches the module's toy sizes).
    seq, d_in, d_out = 8, 32, 16
    key = jax.random.PRNGKey(0)
    kx, kq, kk, kv = jax.random.split(key, 4)
    x = jax.random.normal(kx, (seq, d_in), dtype=jnp.float32)
    w_query = jax.random.normal(kq, (d_out, d_in), dtype=jnp.float32) * 0.1
    w_key = jax.random.normal(kk, (d_out, d_in), dtype=jnp.float32) * 0.1
    w_value = jax.random.normal(kv, (d_out, d_in), dtype=jnp.float32) * 0.1
    ref = _reference(x, w_query, w_key, w_value)

    # Default fast path: bf16 MXU operands, f32 accumulation.
    out = jax.block_until_ready(self_attention_v2(x, w_query, w_key, w_value))
    assert out.shape == (seq, d_out)
    assert jnp.allclose(out, ref, atol=3e-2, rtol=3e-2), "bf16-MXU path mismatch"

    # Exact f32 MXU path (tight tolerance).
    out_f32 = jax.block_until_ready(
        self_attention_v2(x, w_query, w_key, w_value, mxu_dtype=jnp.float32))
    assert jnp.allclose(out_f32, ref, atol=2e-3, rtol=2e-3), "f32 path mismatch"

    # Larger, non-aligned shape exercising the multi-tile grid, decoupled tq != tkv
    # tiles, and the KV padding mask.
    seq2, d_in2, d_out2 = 200, 40, 24
    k2 = jax.random.split(jax.random.PRNGKey(0), 4)
    x2 = jax.random.normal(k2[0], (seq2, d_in2), dtype=jnp.float32)
    wq2 = jax.random.normal(k2[1], (d_out2, d_in2), dtype=jnp.float32) * 0.1
    wk2 = jax.random.normal(k2[2], (d_out2, d_in2), dtype=jnp.float32) * 0.1
    wv2 = jax.random.normal(k2[3], (d_out2, d_in2), dtype=jnp.float32) * 0.1
    ref2 = _reference(x2, wq2, wk2, wv2)

    out2 = jax.block_until_ready(
        self_attention_v2(x2, wq2, wk2, wv2, tile_q=64, tile_kv=32,
                          mxu_dtype=jnp.float32))
    assert out2.shape == (seq2, d_out2)
    assert jnp.allclose(out2, ref2, atol=2e-3, rtol=2e-3), "tiled f32 path mismatch"

    out2_bf16 = jax.block_until_ready(
        self_attention_v2(x2, wq2, wk2, wv2, tile_q=64, tile_kv=32))
    assert jnp.allclose(out2_bf16, ref2, atol=3e-2, rtol=3e-2), "tiled bf16 path mismatch"

    print("KERNEL_OK")
</pallas_src>

<mosaic_0001>
module attributes {stable_mosaic.version = 11 : i64} {
  func.func @_qkv_proj_kernel(%arg0: i32, %arg1: memref<16x128xf32, #tpu.memory_space<vmem>>, %arg2: memref<384x128xbf16, #tpu.memory_space<vmem>>, %arg3: memref<16x128xbf16, #tpu.memory_space<vmem>>, %arg4: memref<16x128xbf16, #tpu.memory_space<vmem>>, %arg5: memref<16x128xbf16, #tpu.memory_space<vmem>>) attributes {dimension_semantics = [#tpu.dimension_semantics<parallel>], iteration_bounds = array<i64: 1>, scalar_prefetch = 0 : i64, scratch_operands = 0 : i64, tpu.core_type = #tpu.core_type<tc>, window_params = [{transform_indices = @transform_0, window_bounds = array<i64: 16, 128>}, {pipeline_mode = #tpu.pipeline_mode<synchronous>, transform_indices = @transform_1, window_bounds = array<i64: 384, 128>}, {transform_indices = @transform_2, window_bounds = array<i64: 16, 128>}, {transform_indices = @transform_3, window_bounds = array<i64: 16, 128>}, {transform_indices = @transform_4, window_bounds = array<i64: 16, 128>}]} {
    %c0 = arith.constant 0 : index
    %c0_0 = arith.constant 0 : index
    %0 = vector.load %arg1[%c0, %c0_0] : memref<16x128xf32, #tpu.memory_space<vmem>>, vector<16x128xf32>
    %1 = arith.truncf %0 : vector<16x128xf32> to vector<16x128xbf16>
    %c0_1 = arith.constant 0 : index
    %c0_2 = arith.constant 0 : index
    %2 = vector.load %arg2[%c0_1, %c0_2] : memref<384x128xbf16, #tpu.memory_space<vmem>>, vector<384x128xbf16>
    %cst = arith.constant dense<0.000000e+00> : vector<16x384xf32>
    %3 = tpu.matmul %1, %2, %cst {dimension_numbers = #tpu.dot_dimension_numbers<[1], [1], [0], [0], [0, 0, 1, 0], [], []>} : vector<16x128xbf16>, vector<384x128xbf16>, vector<16x384xf32> -> vector<16x384xf32>
    %4 = vector.extract_strided_slice %3 {offsets = [0, 0], sizes = [16, 128], strides = [1, 1]} : vector<16x384xf32> to vector<16x128xf32>
    %5 = arith.truncf %4 : vector<16x128xf32> to vector<16x128xbf16>
    %c0_3 = arith.constant 0 : index
    %c0_4 = arith.constant 0 : index
    %6 = vector.load %arg3[%c0_3, %c0_4] : memref<16x128xbf16, #tpu.memory_space<vmem>>, vector<16x128xbf16>
    tpu.vector_store %arg3[%c0_3, %c0_4], %5 {strides = array<i32>} : memref<16x128xbf16, #tpu.memory_space<vmem>>, vector<16x128xbf16>,
    %7 = vector.extract_strided_slice %3 {offsets = [0, 128], sizes = [16, 128], strides = [1, 1]} : vector<16x384xf32> to vector<16x128xf32>
    %8 = arith.truncf %7 : vector<16x128xf32> to vector<16x128xbf16>
    %c0_5 = arith.constant 0 : index
    %c0_6 = arith.constant 0 : index
    %9 = vector.load %arg4[%c0_5, %c0_6] : memref<16x128xbf16, #tpu.memory_space<vmem>>, vector<16x128xbf16>
    tpu.vector_store %arg4[%c0_5, %c0_6], %8 {strides = array<i32>} : memref<16x128xbf16, #tpu.memory_space<vmem>>, vector<16x128xbf16>,
    %10 = vector.extract_strided_slice %3 {offsets = [0, 256], sizes = [16, 128], strides = [1, 1]} : vector<16x384xf32> to vector<16x128xf32>
    %11 = tpu.iota {dimensions = array<i32: 1>} : vector<16x128xi32>
    %c16_i32 = arith.constant 16 : i32
    %12 = vector.broadcast %c16_i32 : i32 to vector<16x128xi32>
    %13 = arith.cmpi eq, %11, %12 : vector<16x128xi32>
    %cst_7 = arith.constant 1.000000e+00 : f32
    %14 = vector.broadcast %cst_7 : f32 to vector<16x128xf32>
    %15 = arith.select %13, %14, %10 : vector<16x128xi1>, vector<16x128xf32>
    %16 = arith.truncf %15 : vector<16x128xf32> to vector<16x128xbf16>
    %c0_8 = arith.constant 0 : index
    %c0_9 = arith.constant 0 : index
    %17 = vector.load %arg5[%c0_8, %c0_9] : memref<16x128xbf16, #tpu.memory_space<vmem>>, vector<16x128xbf16>
    tpu.vector_store %arg5[%c0_8, %c0_9], %16 {strides = array<i32>} : memref<16x128xbf16, #tpu.memory_space<vmem>>, vector<16x128xbf16>,
    return
  }
  func.func @transform_0(%arg0: i32) -> (i32, i32) {
    %c0_i32 = arith.constant 0 : i32
    %c0_i32_0 = arith.constant 0 : i32
    return %arg0, %c0_i32 : i32, i32
  }
  func.func @transform_1(%arg0: i32) -> (i32, i32) {
    %c0_i32 = arith.constant 0 : i32
    %c0_i32_0 = arith.constant 0 : i32
    %c0_i32_1 = arith.constant 0 : i32
    return %c0_i32, %c0_i32_0 : i32, i32
  }
  func.func @transform_2(%arg0: i32) -> (i32, i32) {
    %c0_i32 = arith.constant 0 : i32
    %c0_i32_0 = arith.constant 0 : i32
    return %arg0, %c0_i32 : i32, i32
  }
  func.func @transform_3(%arg0: i32) -> (i32, i32) {
    %c0_i32 = arith.constant 0 : i32
    %c0_i32_0 = arith.constant 0 : i32
    return %arg0, %c0_i32 : i32, i32
  }
  func.func @transform_4(%arg0: i32) -> (i32, i32) {
    %c0_i32 = arith.constant 0 : i32
    %c0_i32_0 = arith.constant 0 : i32
    return %arg0, %c0_i32 : i32, i32
  }
}

</mosaic_0001>

<bundles_post_ra>
// kernel: tpu_custom_call.1
= control target key start
LH: loop header
LB: loop body
LE: loop exit
PB: predicated region body
PF: predicated region fallthrough
CT: control target
= control target key end

     0   :  { %10 = vsyncpa [#allocation3], 0  ;;  %s690_s0 = inlined_call_operand.hbm [shape: f32[16,128], index: 0, kind: input, shape index: {}]   ;;  %s691_s1 = inlined_call_operand.hbm [shape: bf16[384,128], index: 1, kind: input, shape index: {}]   ;;  %s692_s2 = inlined_call_operand.hbm [shape: bf16[16,128], index: 2, kind: output, shape index: {0}]   ;;  %s693_s3 = inlined_call_operand.hbm [shape: bf16[16,128], index: 3, kind: output, shape index: {1}]   ;;  %s694_s4 = inlined_call_operand.hbm [shape: bf16[16,128], index: 4, kind: output, shape index: {2}]  }
   0x1   :  { %11 = vsyncpa [#allocation6], 0 }
   0x2   :  { %12 = vsyncpa [#allocation4], 0 }
   0x3   :  { %13 = vsyncpa [#allocation9], 0  ;;  %s18_s17 = sshll.u32 %s690_s0, 4  ;;  %s629_s18 = smov [#allocation2]   ;;  %s19_s17 = int_to_ptr.hbm [resolvable:$true] %s18_s17 }
   0x4   :  { %s20_s19 = sshll.u32 %s629_s18, 4  ;;  %s31_s22 = sshll.u32 %s691_s1, 4  ;;  %s21_s19 = int_to_ptr.vmem [resolvable:$true] %s20_s19  ;;  %s32_s22 = int_to_ptr.hbm [resolvable:$true] %s31_s22 }
   0x5   :  { %s630_s23 = smov 128   ;;  %s631_s24 = smov 8  }
   0x6   :  { %26 = dma.hbm_to_vmem [thread:$0]  %s19_s17, 256, %s21_s19, [#allocation3], %s630_s23, %s630_s23, %s631_s24  }
   0x7   :  { %s632_s25 = smov [#allocation5]   ;;  %s633_s27 = smov 64  }
   0x8   :  { %s33_s26 = sshll.u32 %s632_s25, 4  ;;  %s634_s28 = smov 4   ;;  %s34_s26 = int_to_ptr.vmem [resolvable:$true] %s33_s26 }
   0x9   :  { %39 = dma.hbm_to_vmem [thread:$0]  %s32_s22, 3072, %s34_s26, [#allocation6], %s633_s27, %s633_s27, %s634_s28  }
   0xa   :  { %621 = dma.done.wait [#allocation3], 256  }
   0xb   :  { %622 = vsyncadd [#allocation3], 4294967040 }
   0xc   :  { %623 = dma.done.wait [#allocation6], 3072  }
   0xd   :  { %624 = vsyncadd [#allocation6], 4294964224  ;;  %v460_v0 = vld [vmem:[#allocation5 + $0x38] sm:$0xff]  ;;  %v459_v3 = vld [vmem:[#allocation5 + $0x30] sm:$0xff]  ;;  %v293_v29 = vlaneseq  ;;  %s635_s0 = smov [#allocation7]   ;;  %s308_s5 = sshll.u32 %s692_s2, 4  ;;  %s309_s5 = int_to_ptr.hbm [resolvable:$true] %s308_s5 }
   0xe   :  { %v468_v1 = vld [vmem:[#allocation5 + $0x78] sm:$0xff]  ;;  %243 = vmatpush.bf16.xpose.msra.mxu0 %v460_v0  ;;  %v467_v4 = vld [vmem:[#allocation5 + $0x70] sm:$0xff]  ;;  %v458_v6 = vld [vmem:[#allocation5 + $0x28] sm:$0xff]  ;;  %s306_s1 = sshll.u32 %s635_s0, 4  ;;  %s636_s6 = smov [#allocation8]   ;;  %s307_s1 = int_to_ptr.vmem [resolvable:$true] %s306_s1 }
   0xf   :  { %v476_v2 = vld [vmem:[#allocation5 + $0xb8] sm:$0xff]  ;;  %257 = vmatpush.bf16.xpose.msra.mxu1 %v468_v1  ;;  %v475_v5 = vld [vmem:[#allocation5 + $0xb0] sm:$0xff]  ;;  %v466_v7 = vld [vmem:[#allocation5 + $0x68] sm:$0xff]  ;;  %s319_s7 = sshll.u32 %s636_s6, 4  ;;  %s321_s10 = sshll.u32 %s693_s3, 4  ;;  %v294_v33 = vand.u32 127, %v293_v29  ;;  %s320_s7 = int_to_ptr.vmem [resolvable:$true] %s319_s7  ;;  %s322_s10 = int_to_ptr.hbm [resolvable:$true] %s321_s10 }
  0x10   :  { %271 = vmatpush.bf16.xpose.msra.mxu2 %v476_v2  ;;  %v474_v8 = vld [vmem:[#allocation5 + $0xa8] sm:$0xff]  ;;  %v457_v9 = vld [vmem:[#allocation5 + $0x20] sm:$0xff]  ;;  %v456_v12 = vld [vmem:[#allocation5 + $0x18] sm:$0xff]  ;;  %s637_s2 = smov [#allocation10]   ;;  %s334_s13 = sshll.u32 %s694_s4, 4  ;;  %s335_s13 = int_to_ptr.hbm [resolvable:$true] %s334_s13 }
  0x11   :  { %v465_v10 = vld [vmem:[#allocation5 + $0x60] sm:$0xff]  ;;  %v464_v13 = vld [vmem:[#allocation5 + $0x58] sm:$0xff]  ;;  %v455_v15 = vld [vmem:[#allocation5 + $0x10] sm:$0xff]  ;;  %vm295_vm0 = vcmp.eq.s32.totalorder %v294_v33, 16  ;;  %s332_s3 = sshll.u32 %s637_s2, 4  ;;  %s333_s3 = int_to_ptr.vmem [resolvable:$true] %s332_s3 }
  0x12   :  { %v473_v11 = vld [vmem:[#allocation5 + $0xa0] sm:$0xff]  ;;  %v472_v14 = vld [vmem:[#allocation5 + $0x98] sm:$0xff]  ;;  %v463_v16 = vld [vmem:[#allocation5 + $0x50] sm:$0xff] }
  0x13   :  { %v471_v17 = vld [vmem:[#allocation5 + $0x90] sm:$0xff]  ;;  %v454_v18 = vld [vmem:[#allocation5 + $0x8] sm:$0xff]  ;;  %v453_v21 = vld [vmem:[#allocation5] sm:$0xff] }
  0x14   :  { %v462_v19 = vld [vmem:[#allocation5 + $0x48] sm:$0xff]  ;;  %v461_v22 = vld [vmem:[#allocation5 + $0x40] sm:$0xff]  ;;  %v48_v24 = vld [vmem:[#allocation2] sm:$0xff] }
  0x15   :  { %v470_v20 = vld [vmem:[#allocation5 + $0x88] sm:$0xff]  ;;  %v469_v23 = vld [vmem:[#allocation5 + $0x80] sm:$0xff]  ;;  %v49_v25 = vld [vmem:[#allocation2 + $0x8] sm:$0xff] }
  0x16   :  { %244 = vmatpush.bf16.xpose.msra.mxu0 %v459_v3  ;;  %v50_v26 = vpack.c.bf16 %v49_v25, %v48_v24 }
  0x17   :  { %258 = vmatpush.bf16.xpose.msra.mxu1 %v467_v4 }
  0x18   :  { %272 = vmatpush.bf16.xpose.msra.mxu2 %v475_v5 }
  0x1e   :  { %245 = vmatpush.bf16.xpose.msra.mxu0 %v458_v6 }
  0x1f   :  { %259 = vmatpush.bf16.xpose.msra.mxu1 %v466_v7 }
  0x20   :  { %273 = vmatpush.bf16.xpose.msra.mxu2 %v474_v8 }
  0x26   :  { %246 = vmatpush.bf16.xpose.msra.mxu0 %v457_v9 }
  0x27   :  { %260 = vmatpush.bf16.xpose.msra.mxu1 %v465_v10 }
  0x28   :  { %274 = vmatpush.bf16.xpose.msra.mxu2 %v473_v11 }
  0x2e   :  { %247 = vmatpush.bf16.xpose.msra.mxu0 %v456_v12 }
  0x2f   :  { %261 = vmatpush.bf16.xpose.msra.mxu1 %v464_v13 }
  0x30   :  { %275 = vmatpush.bf16.xpose.msra.mxu2 %v472_v14 }
  0x36   :  { %248 = vmatpush.bf16.xpose.msra.mxu0 %v455_v15 }
  0x37   :  { %262 = vmatpush.bf16.xpose.msra.mxu1 %v463_v16 }
  0x38   :  { %276 = vmatpush.bf16.xpose.msra.mxu2 %v471_v17 }
  0x3e   :  { %249 = vmatpush.bf16.xpose.msra.mxu0 %v454_v18 }
  0x3f   :  { %263 = vmatpush.bf16.xpose.msra.mxu1 %v462_v19 }
  0x40   :  { %277 = vmatpush.bf16.xpose.msra.mxu2 %v470_v20 }
  0x46   :  { %250 = vmatpush.bf16.xpose.msra.mxu0 %v453_v21 }
  0x47   :  { %264 = vmatpush.bf16.xpose.msra.mxu1 %v461_v22 }
  0x48   :  { %278 = vmatpush.bf16.xpose.msra.mxu2 %v469_v23 }
  0x4d   :  { %251 = vmatmul.bf16.vlgmr.msra.gmra.mxu0 %v50_v26 }
  0x4e   :  { %265 = vmatmul.bf16.vlgmr.msra.gmra.mxu1 %v50_v26 }
  0x4f   :  { %279 = vmatmul.bf16.vlgmr.msra.gmra.mxu2 %v50_v26 }
  0xca   :  { %v252_v27 = vpop.f32.mrf.mxu0 }
  0xcb   :  { %v266_v28 = vpop.f32.mrf.mxu1 }
  0xd2   :  { %v280_v30 = vpop.f32.mrf.mxu2  ;;  %v254_v31 = vpop.f32.mrf.mxu0 }
  0xd3   :  { %v268_v32 = vpop.f32.mrf.mxu1  ;;  %v480_v34 = vpack.c.bf16 %v254_v31, %v252_v27  ;;  %v296_v37 = vsel %vm295_vm0, 1.0, %v280_v30 }
  0xd4   :  { %v485_v35 = vpack.c.bf16 %v268_v32, %v266_v28 }
  0xd5   :  { %481 = vst [vmem:[#allocation7] sm:$0xff] %v480_v34  }
  0xd6   :  { %486 = vst [vmem:[#allocation8] sm:$0xff] %v485_v35   ;;  %314 = dma.vmem_to_hbm [thread:$0]  %s307_s1, 128, %s309_s5, [#allocation4], %s633_s27, %s633_s27, %s634_s28  }
  0xd7   :  { %327 = dma.vmem_to_hbm [thread:$0]  %s320_s7, 128, %s322_s10, [#allocation9], %s633_s27, %s633_s27, %s634_s28  }
  0xda   :  { %v282_v36 = vpop.f32.mrf.mxu2 }
  0xdb   :  { %v297_v38 = vsel %vm295_vm0, 1.0, %v282_v36 }
  0xdc   :  { %v490_v39 = vpack.c.bf16 %v297_v38, %v296_v37 }
  0xde   :  { %491 = vst [vmem:[#allocation10] sm:$0xff] %v490_v39  }
  0xdf   :  { %340 = dma.vmem_to_hbm [thread:$0]  %s333_s3, 128, %s335_s13, [#allocation9], %s633_s27, %s633_s27, %s634_s28  }
  0xe0   :  { %625 = dma.done.wait [#allocation4], 128  }
  0xe1   :  { %626 = vsyncadd [#allocation4], 4294967168 }
  0xe2   :  { %627 = dma.done.wait [#allocation9], 256  }
  0xe3   :  { %628 = vsyncadd [#allocation9], 4294967040 }
  0xe4   :  { %353 = vsyncpa [#allocation3], 1 }
  0xe5   :  { %354 = vsyncpa [#allocation6], 1 }
  0xe6   :  { %355 = vsyncpa [#allocation4], 1 }
  0xe7   :  { %356 = vsyncpa [#allocation9], 1 }

</bundles_post_ra>
